<compile_context>
chip_gen: v7x
topology: tpu7x:2x2x1
jax: 0.10.0
libtpu: 0.0.40
codegen_flags: <defaults>
</compile_context>

<pallas_src>
import functools

import jax
import jax.numpy as jnp
from jax.experimental import pallas as pl
from jax.experimental.pallas import tpu as pltpu


def _ce_onehot_partial_kernel(preds_ref, labels_ref, partial_ref, *, n_rows, tn):
    # Row-validity mask for the (possibly partial) trailing tile.  There is no
    # wrapper-side padding, so out-of-bounds rows may hold garbage: mask BOTH
    # x and lbl before any arithmetic (otherwise garbage*0 could be NaN).
    row = pl.program_id(0) * tn + jax.lax.broadcasted_iota(jnp.int32, (tn, 1), 0)
    valid = row < n_rows                                               # (tn, 1)

    # Cast after load: inputs travel through the DMA in their storage dtype.
    x = jnp.where(valid, preds_ref[...].astype(jnp.float32), 0.0)      # (tn, C)
    lbl = jnp.where(valid, labels_ref[...].astype(jnp.float32), 0.0)   # (tn, C)

    # Numerically-stable logsumexp along the class (lane) axis.
    m = jnp.max(x, axis=-1, keepdims=True)                             # (tn, 1)
    se = jnp.sum(jnp.exp(x - m), axis=-1, keepdims=True)               # (tn, 1)
    z = m + jnp.log(se)                                                # (tn, 1)

    # sum_c( -lbl * log_softmax(x) ) = z * sum_c(lbl) - sum_c(lbl * x)
    # Masked rows: lbl == 0 everywhere -> contribute exactly 0.
    s_lbl = jnp.sum(lbl, axis=-1, keepdims=True)                       # (tn, 1)
    s_lx = jnp.sum(lbl * x, axis=-1, keepdims=True)                    # (tn, 1)
    rowloss = z * s_lbl - s_lx                                         # (tn, 1)

    # One scalar per grid step (sublane reduce rides the otherwise-idle XLU);
    # avoids a lane-sparse (tn, 1) HBM writeback and its masked vst.msk stores.
    partial_ref[...] = jnp.sum(rowloss, axis=0, keepdims=True)         # (1, 1)


def cross_entropy_loss_one_hot(preds, labels):
    """JAX/Pallas equivalent of CrossEntropyLossOneHot.forward."""
    assert preds.shape == labels.shape
    c = preds.shape[-1]
    preds2d = preds.reshape(-1, c)
    labels2d = labels.reshape(-1, c)
    n = preds2d.shape[0]

    p_item = jnp.dtype(preds2d.dtype).itemsize
    l_item = jnp.dtype(labels2d.dtype).itemsize
    # Sublane multiple for the narrowest storage dtype: 8 f32, 16 bf16, 32 i8/fp8.
    sublane = 32 // min(p_item, l_item)

    # --- generation-aware VMEM / tile budget --------------------------------
    try:
        vmem_cap = int(getattr(pltpu.get_tpu_info(), "vmem_capacity_bytes",
                               64 * 1024 * 1024))
    except Exception:  # pragma: no cover - conservative fallback
        vmem_cap = 64 * 1024 * 1024
    if vmem_cap >= 100 * 1024 * 1024:   # v5e / v6e: 128 MiB physical VMEM, 1 TC
        input_budget = 8 * 1024 * 1024  # combined per-step input payload (storage dtype)
        vmem_limit = 64 * 1024 * 1024
        min_tiles = 1
    else:                               # v7x: 64 MiB physical VMEM, 2 TCs
        input_budget = 4 * 1024 * 1024
        vmem_limit = 32 * 1024 * 1024
        min_tiles = 4                   # keep both TensorCores busy

    # Rows per tile from the byte budget in the *storage* dtype.
    bytes_per_row = (p_item + l_item) * c
    cap = max(sublane, (input_budget // bytes_per_row) // sublane * sublane)
    cap = min(cap, 32768)

    n_up = ((n + sublane - 1) // sublane) * sublane
    if min_tiles > 1:
        # Ensure >= min_tiles grid steps on multi-TC chips when N is modest.
        per_tile = -(-n_up // min_tiles)
        per_tile = ((per_tile + sublane - 1) // sublane) * sublane
        cap = min(cap, max(sublane, per_tile))

    tn = int(max(sublane, min(cap, n_up)))
    num_tiles = -(-n // tn)             # cdiv; kernel masks the ragged tail

    kernel = functools.partial(_ce_onehot_partial_kernel, n_rows=n, tn=tn)

    cost = pl.CostEstimate(
        flops=5 * n * c,
        transcendentals=n * c + n,
        bytes_accessed=n * c * (p_item + l_item) + num_tiles * 4,
    )

    # TODO(synk): for vocab-scale C (where even an (sublane, C) f32 tile blows
    # the VMEM budget, earliest on v7x) add a second "arbitrary" grid axis over
    # classes with an online/streaming logsumexp; the row axis stays "parallel".
    partials = pl.pallas_call(
        kernel,
        out_shape=jax.ShapeDtypeStruct((num_tiles, 1), jnp.float32),
        grid=(num_tiles,),
        in_specs=[
            pl.BlockSpec((tn, c), lambda i: (i, 0)),
            pl.BlockSpec((tn, c), lambda i: (i, 0)),
        ],
        out_specs=pl.BlockSpec((1, 1), lambda i: (i, 0)),
        compiler_params=pltpu.CompilerParams(
            dimension_semantics=("parallel",),   # no carried state -> megacore OK
            vmem_limit_bytes=vmem_limit,
        ),
        cost_estimate=cost,
    )(preds2d, labels2d)

    # Tiny final reduction + mean over the true row count.
    return jnp.sum(partials) / jnp.float32(n)


def _reference(preds, labels):
    logp = jax.nn.log_softmax(preds.astype(jnp.float32), axis=-1)
    return jnp.mean(jnp.sum(-labels.astype(jnp.float32) * logp, axis=-1))


if __name__ == "__main__":
    key = jax.random.PRNGKey(0)
    k1, k2, k3, k4 = jax.random.split(key, 4)

    # Case 1: small, tile-aligned.
    batch, num_classes = 8, 32
    preds = jax.random.normal(k1, (batch, num_classes), dtype=jnp.float32)
    labels = jax.nn.softmax(
        jax.random.normal(k2, (batch, num_classes), dtype=jnp.float32), axis=-1
    )
    loss = cross_entropy_loss_one_hot(preds, labels)
    jax.block_until_ready(loss)
    ref = _reference(preds, labels)
    assert jnp.allclose(loss, ref, atol=1e-5, rtol=1e-5), (loss, ref)

    # Case 2: leading batch dims + row count that is not a multiple of the
    # sublane/tile (exercises the flatten + in-kernel ragged-row masking path).
    preds2 = jax.random.normal(k3, (2, 5, num_classes), dtype=jnp.float32)
    labels2 = jax.nn.softmax(
        jax.random.normal(k4, (2, 5, num_classes), dtype=jnp.float32), axis=-1
    )
    loss2 = cross_entropy_loss_one_hot(preds2, labels2)
    jax.block_until_ready(loss2)
    ref2 = _reference(preds2, labels2)
    assert jnp.allclose(loss2, ref2, atol=1e-5, rtol=1e-5), (loss2, ref2)

    print("KERNEL_OK")
</pallas_src>

<mosaic_0001>
module attributes {stable_mosaic.version = 11 : i64} {
  func.func @_ce_onehot_partial_kernel(%arg0: i32, %arg1: memref<8x32xf32, #tpu.memory_space<vmem>>, %arg2: memref<8x32xf32, #tpu.memory_space<vmem>>, %arg3: memref<1x1xf32, #tpu.memory_space<vmem>>) attributes {dimension_semantics = [#tpu.dimension_semantics<parallel>], iteration_bounds = array<i64: 1>, scalar_prefetch = 0 : i64, scratch_operands = 0 : i64, tpu.core_type = #tpu.core_type<tc>, window_params = [{transform_indices = @transform_0, window_bounds = array<i64: 8, 32>}, {transform_indices = @transform_1, window_bounds = array<i64: 8, 32>}, {transform_indices = @transform_2, window_bounds = array<i64: 1, 1>}]} {
    %c8_i32 = arith.constant 8 : i32
    %0 = arith.muli %arg0, %c8_i32 : i32
    %1 = tpu.iota {dimensions = array<i32: 0>} : vector<8x1xi32>
    %2 = vector.broadcast %0 : i32 to vector<8x1xi32>
    %3 = arith.addi %2, %1 : vector<8x1xi32>
    %c8_i32_0 = arith.constant 8 : i32
    %4 = vector.broadcast %c8_i32_0 : i32 to vector<8x1xi32>
    %5 = arith.cmpi slt, %3, %4 : vector<8x1xi32>
    %c0 = arith.constant 0 : index
    %c0_1 = arith.constant 0 : index
    %6 = vector.load %arg1[%c0, %c0_1] : memref<8x32xf32, #tpu.memory_space<vmem>>, vector<8x32xf32>
    %cst = arith.constant 0.000000e+00 : f32
    %7 = vector.shape_cast %5 : vector<8x1xi1> to vector<8x1xi1>
    %8 = vector.broadcast %7 : vector<8x1xi1> to vector<8x32xi1>
    %9 = vector.broadcast %cst : f32 to vector<8x32xf32>
    %10 = arith.select %8, %6, %9 : vector<8x32xi1>, vector<8x32xf32>
    %c0_2 = arith.constant 0 : index
    %c0_3 = arith.constant 0 : index
    %11 = vector.load %arg2[%c0_2, %c0_3] : memref<8x32xf32, #tpu.memory_space<vmem>>, vector<8x32xf32>
    %cst_4 = arith.constant 0.000000e+00 : f32
    %12 = vector.shape_cast %5 : vector<8x1xi1> to vector<8x1xi1>
    %13 = vector.broadcast %12 : vector<8x1xi1> to vector<8x32xi1>
    %14 = vector.broadcast %cst_4 : f32 to vector<8x32xf32>
    %15 = arith.select %13, %11, %14 : vector<8x32xi1>, vector<8x32xf32>
    %cst_5 = arith.constant dense<0xFF800000> : vector<8xf32>
    %16 = vector.multi_reduction <maximumf>, %10, %cst_5 [1] : vector<8x32xf32> to vector<8xf32>
    %17 = vector.shape_cast %16 : vector<8xf32> to vector<8x1xf32>
    %18 = vector.broadcast %17 : vector<8x1xf32> to vector<8x32xf32>
    %19 = arith.subf %10, %18 : vector<8x32xf32>
    %20 = math.exp %19 : vector<8x32xf32>
    %cst_6 = arith.constant dense<0.000000e+00> : vector<8xf32>
    %21 = vector.multi_reduction <add>, %20, %cst_6 [1] : vector<8x32xf32> to vector<8xf32>
    %22 = vector.shape_cast %21 : vector<8xf32> to vector<8x1xf32>
    %23 = math.log %22 : vector<8x1xf32>
    %24 = arith.addf %17, %23 : vector<8x1xf32>
    %cst_7 = arith.constant dense<0.000000e+00> : vector<8xf32>
    %25 = vector.multi_reduction <add>, %15, %cst_7 [1] : vector<8x32xf32> to vector<8xf32>
    %26 = vector.shape_cast %25 : vector<8xf32> to vector<8x1xf32>
    %27 = arith.mulf %15, %10 : vector<8x32xf32>
    %cst_8 = arith.constant dense<0.000000e+00> : vector<8xf32>
    %28 = vector.multi_reduction <add>, %27, %cst_8 [1] : vector<8x32xf32> to vector<8xf32>
    %29 = vector.shape_cast %28 : vector<8xf32> to vector<8x1xf32>
    %30 = arith.mulf %24, %26 : vector<8x1xf32>
    %31 = arith.subf %30, %29 : vector<8x1xf32>
    %cst_9 = arith.constant dense<0.000000e+00> : vector<1xf32>
    %32 = vector.multi_reduction <add>, %31, %cst_9 [0] : vector<8x1xf32> to vector<1xf32>
    %33 = vector.shape_cast %32 : vector<1xf32> to vector<1x1xf32>
    %c0_10 = arith.constant 0 : index
    %c0_11 = arith.constant 0 : index
    %34 = vector.load %arg3[%c0_10, %c0_11] : memref<1x1xf32, #tpu.memory_space<vmem>>, vector<1x1xf32>
    tpu.vector_store %arg3[%c0_10, %c0_11], %33 {strides = array<i32>} : memref<1x1xf32, #tpu.memory_space<vmem>>, vector<1x1xf32>,
    return
  }
  func.func @transform_0(%arg0: i32) -> (i32, i32) {
    %c0_i32 = arith.constant 0 : i32
    %c0_i32_0 = arith.constant 0 : i32
    return %arg0, %c0_i32 : i32, i32
  }
  func.func @transform_1(%arg0: i32) -> (i32, i32) {
    %c0_i32 = arith.constant 0 : i32
    %c0_i32_0 = arith.constant 0 : i32
    return %arg0, %c0_i32 : i32, i32
  }
  func.func @transform_2(%arg0: i32) -> (i32, i32) {
    %c0_i32 = arith.constant 0 : i32
    %c0_i32_0 = arith.constant 0 : i32
    return %arg0, %c0_i32 : i32, i32
  }
}

</mosaic_0001>

<bundles_post_ra>
// kernel: tpu_custom_call.1
= control target key start
LH: loop header
LB: loop body
LE: loop exit
PB: predicated region body
PF: predicated region fallthrough
CT: control target
= control target key end

     0   :  { %7 = vsyncpa [#allocation3], 0  ;;  %s227_s0 = inlined_call_operand.hbm [shape: f32[8,32], index: 0, kind: input, shape index: {}]   ;;  %s228_s1 = inlined_call_operand.hbm [shape: f32[8,32], index: 1, kind: input, shape index: {}]   ;;  %s229_s2 = inlined_call_operand.hbm [shape: f32[1,1], index: 2, kind: output, shape index: {}]  }
   0x1   :  { %8 = vsyncpa [#allocation6], 0 }
   0x2   :  { %9 = vsyncpa [#allocation4], 0  ;;  %s173_s9 = smov [#allocation2]   ;;  %s174_s11 = smov [#allocation5]  }
   0x3   :  { %s16_s10 = sshll.u32 %s173_s9, 4  ;;  %s26_s12 = sshll.u32 %s174_s11, 4  ;;  %s17_s10 = int_to_ptr.vmem [resolvable:$true] %s16_s10  ;;  %s27_s12 = int_to_ptr.vmem [resolvable:$true] %s26_s12 }
   0x4   :  { %s101_s15 = scalar_lea.hbm %s227_s0, 128 }
   0x5   :  { %p102_p0 = scmp.ne.s32.totalorder %s227_s0, %s101_s15  ;;  %p105_p1 = scmp.lt.u32.totalorder %s101_s15, %s227_s0 }
   0x7   :  { %p107_p2 = pnand %p105_p1, %p102_p0 }
   0x9   :  { %110 = shalt.err (!%p107_p2)
}
   0xa   :  { %s111_s20 = scalar_lea.vmem %s17_s10, 128  ;;  %p116_p4 = scmp.lt.s32.totalorder %s17_s10, %s17_s10 }
   0xb   :  { %p112_p3 = scmp.ne.s32.totalorder %s17_s10, %s111_s20  ;;  %p117_p5 = scmp.lt.s32.totalorder %s111_s20, %s111_s20 }
   0xd   :  { %p118_p6 = por %p117_p5, %p116_p4 }
   0xf   :  { %p119_p7 = pnand %p118_p6, %p112_p3 }
  0x11   :  { %122 = shalt.err (!%p119_p7)
}
  0x12   :  { %19 = dma.hbm_to_vmem [thread:$0]  %s227_s0, 128, %s17_s10, [#allocation3]  }
  0x13   :  { %s123_s25 = scalar_lea.hbm %s228_s1, 128 }
  0x14   :  { %p124_p8 = scmp.ne.s32.totalorder %s228_s1, %s123_s25  ;;  %p127_p9 = scmp.lt.u32.totalorder %s123_s25, %s228_s1 }
  0x16   :  { %p129_p10 = pnand %p127_p9, %p124_p8 }
  0x18   :  { %132 = shalt.err (!%p129_p10)
}
  0x19   :  { %s133_s30 = scalar_lea.vmem %s27_s12, 128  ;;  %p138_p12 = scmp.lt.s32.totalorder %s27_s12, %s27_s12 }
  0x1a   :  { %p134_p11 = scmp.ne.s32.totalorder %s27_s12, %s133_s30  ;;  %p139_p13 = scmp.lt.s32.totalorder %s133_s30, %s133_s30 }
  0x1c   :  { %p140_p0 = por %p139_p13, %p138_p12 }
  0x1e   :  { %p141_p1 = pnand %p140_p0, %p134_p11 }
  0x20   :  { %144 = shalt.err (!%p141_p1)
}
  0x21   :  { %29 = dma.hbm_to_vmem [thread:$0]  %s228_s1, 128, %s27_s12, [#allocation6]  }
  0x22   :  { %167 = dma.done.wait [#allocation3], 128  }
  0x23   :  { %168 = vsyncadd [#allocation3], 4294967168 }
  0x24   :  { %169 = dma.done.wait [#allocation6], 128  }
  0x25   :  { %170 = vsyncadd [#allocation6], 4294967168  ;;  %vm48_vm0 = vcmask 261120   ;;  %v42_v0 = vld [vmem:[#allocation2] sm:$0xff]  ;;  %v46_v2 = vld [vmem:[#allocation5] sm:$0xff]  ;;  %s175_s1 = smov [#allocation7]  }
  0x26   :  { %v49_v1 = vsel %vm48_vm0, %v42_v0, -inf  ;;  %v61_v3 = vsel %vm48_vm0, %v46_v2, 0.0  ;;  %v64_v4 = vmul.f32 %v46_v2, %v42_v0  ;;  %s84_s4 = sshll.u32 %s175_s1, 4  ;;  %vm76_vm1 = vcmask 0   ;;  %s85_s4 = int_to_ptr.vmem [resolvable:$true] %s84_s4 }
  0x27   :  { %50 = vmax.xlane.f32.xlu0 %v49_v1  ;;  %62 = vadd.xlane.f32.xlu1 %v61_v3  ;;  %s145_s5 = scalar_lea.vmem %s85_s4, 16  ;;  %s149_s6 = scalar_lea.vmem %s85_s4, 32 }
  0x28   :  { %v65_v5 = vsel %vm48_vm0, %v64_v4, 0.0  ;;  %p146_p2 = scmp.ne.s32.totalorder %s85_s4, %s145_s5  ;;  %p150_p3 = scmp.lt.s32.totalorder %s85_s4, %s85_s4 }
  0x29   :  { %p151_p4 = scmp.lt.s32.totalorder %s149_s6, %s145_s5 }
  0x2b   :  { %66 = vadd.xlane.f32.xlu1 %v65_v5  ;;  %p152_p5 = por %p151_p4, %p150_p3 }
  0x2d   :  { %p153_p6 = pnand %p152_p5, %p146_p2 }
  0xb4   :  { %v51_v6 = vpop.xlane.xlu0 %50  ;;  %v63_v12 = vpop.xlane.xlu1 %62 }
  0xb5   :  { %v52_v7 = vsub.f32 %v42_v0, %v51_v6 }
  0xb7   :  { %v53_v8 = vmul.f32 1.442695, %v52_v7 }
  0xb8   :  { %v67_v16 = vpop.xlane.xlu1 %66 }
  0xb9   :  { %97 = vpow2.f32 %v53_v8 }
  0xc3   :  { %v98_v9 = vpop.eup %97 }
  0xc4   :  { %v55_v10 = vsel %vm48_vm0, %v98_v9, 0.0 }
  0xc5   :  { %56 = vadd.xlane.f32.xlu0 %v55_v10 }
 0x152   :  { %v57_v11 = vpop.xlane.xlu0 %56 }
 0x153   :  { %99 = vlog2.f32 %v57_v11 }
 0x15d   :  { %v100_v13 = vpop.eup %99 }
 0x15e   :  { %v59_v14 = vmul.f32 0.6931472, %v100_v13 }
 0x160   :  { %v60_v15 = vadd.f32 %v59_v14, %v51_v6 }
 0x162   :  { %v68_v17 = vmul.f32 %v63_v12, %v60_v15 }
 0x164   :  { %v69_v18 = vsub.f32 %v68_v17, %v67_v16 }
 0x166   :  { %v70_v19 = vrot.slane %v69_v18, 4 }
 0x168   :  { %v71_v20 = vadd.f32 %v70_v19, %v69_v18 }
 0x16a   :  { %v72_v21 = vrot.slane %v71_v20, 2 }
 0x16c   :  { %v73_v22 = vadd.f32 %v72_v21, %v71_v20 }
 0x16e   :  { %v74_v23 = vrot.slane %v73_v22, 1 }
 0x170   :  { %v75_v24 = vadd.f32 %v74_v23, %v73_v22 }
 0x172   :  { %77 = vst.msk [vmem:[#allocation7] sm:$0x1] %vm76_vm1, %v75_v24 }
 0x173   :  { %156 = shalt.err (!%p153_p6)
}
 0x174   :  { %s157_s9 = scalar_lea.hbm %s229_s2, 16 }
 0x175   :  { %p158_p7 = scmp.ne.s32.totalorder %s229_s2, %s157_s9  ;;  %p161_p8 = scmp.lt.u32.totalorder %s157_s9, %s229_s2 }
 0x177   :  { %p163_p9 = pnand %p161_p8, %p158_p7 }
 0x179   :  { %166 = shalt.err (!%p163_p9)
}
 0x17a   :  { %87 = dma.vmem_to_hbm [thread:$0]  %s85_s4, 16, %s229_s2, [#allocation4]  }
 0x17b   :  { %171 = dma.done.wait [#allocation4], 16  }
 0x17c   :  { %172 = vsyncadd [#allocation4], 4294967280 }
 0x17d   :  { %91 = vsyncpa [#allocation3], 1 }
 0x17e   :  { %92 = vsyncpa [#allocation6], 1 }
 0x17f   :  { %93 = vsyncpa [#allocation4], 1 }

</bundles_post_ra>
